<compile_context>
chip_gen: v6e
topology: v6e:2x2x1
jax: 0.10.0
libtpu: 0.0.40
codegen_flags: <defaults>
</compile_context>

<pallas_src>
import functools
import math

import jax
import jax.numpy as jnp
from jax.experimental import pallas as pl
from jax.experimental.pallas import tpu as pltpu

_LN_EPS = 1e-6


def _round_up(x, m):
    return ((x + m - 1) // m) * m


def _tpu_vmem_bytes(default=64 * 1024 * 1024):
    try:
        info = pltpu.get_tpu_info()
        cap = getattr(info, "vmem_capacity_bytes", None)
        if cap:
            return int(cap)
    except Exception:
        pass
    return default


def _vmem_limit_bytes():
    # Generation-aware scoped-VMEM limit (~60% of physical, capped).
    return int(min(_tpu_vmem_bytes() * 0.6, 96 * 1024 * 1024))


def _spec(block_shape, index_map, *, single_buffer=False):
    """BlockSpec; grid-invariant blocks are single-buffered (halves their VMEM)."""
    if single_buffer:
        try:
            return pl.BlockSpec(block_shape, index_map, pipeline_mode=pl.Buffered(1))
        except (TypeError, AttributeError):
            pass
    return pl.BlockSpec(block_shape, index_map)


def _layer_norm_f32(x_f32, gamma, beta):
    """LayerNorm over the last (lane) dim, eps=1e-6, params broadcast from (1, D)."""
    mean = jnp.mean(x_f32, axis=-1, keepdims=True)
    var = jnp.mean(jnp.square(x_f32 - mean), axis=-1, keepdims=True)
    return (x_f32 - mean) * jax.lax.rsqrt(var + _LN_EPS) * gamma + beta


# ----------------------------------------------------------------------------- #
# Kernel 1: multi-head self-attention + output projection + residual + LayerNorm
# grid = (batch, q-row tiles); K/V projected once per batch element into scratch
# ----------------------------------------------------------------------------- #
def _mha_ln_kernel(n_heads, d_k, tq, approx_recip,
                   x_ref, mask_ref, wqkv_ref, wo_ref, g_ref, b_ref,
                   o_ref, k_ref, v_ref, ctx_ref):
    D = n_heads * d_k
    qi = pl.program_id(1)
    cdt = wqkv_ref.dtype  # compute dtype for MXU operands (bf16 in the bf16 path)

    @pl.when(qi == 0)
    def _():
        # K/V projections once per batch element (fused (D, 2D) matmul), cached in VMEM.
        kv = jnp.dot(x_ref[0], wqkv_ref[:, D:], preferred_element_type=jnp.float32)
        k_ref[...] = kv[:, :D].astype(cdt)
        v_ref[...] = kv[:, D:].astype(cdt)

    row0 = pl.multiple_of(qi * tq, tq)
    x_q = x_ref[0, pl.ds(row0, tq), :]                                # (tq, D)
    # Q projection for this q-tile; 1/sqrt(d_k) is folded into wqkv's Q columns.
    q = jnp.dot(x_q, wqkv_ref[:, :D], preferred_element_type=jnp.float32).astype(cdt)
    m = mask_ref[0, 0].astype(jnp.float32)                            # (tq, T)

    for h in range(n_heads):                                          # static unroll over heads
        sl = slice(h * d_k, (h + 1) * d_k)
        s = jax.lax.dot_general(q[:, sl], k_ref[:, sl], (((1,), (1,)), ((), ())),
                                preferred_element_type=jnp.float32)   # (tq, T)
        s = s + m
        s = s - jnp.max(s, axis=-1, keepdims=True)
        e = jnp.exp(s)                                                # EUP slot
        p = e * pl.reciprocal(jnp.sum(e, axis=-1, keepdims=True), approx=approx_recip)
        # Write this head's context into its lane slice; frees per-head temporaries.
        ctx_ref[:, sl] = jnp.dot(p.astype(cdt), v_ref[:, sl],
                                 preferred_element_type=jnp.float32).astype(cdt)

    y = jnp.dot(ctx_ref[...], wo_ref[...], preferred_element_type=jnp.float32)
    out = _layer_norm_f32(x_q.astype(jnp.float32) + y, g_ref[...], b_ref[...])
    o_ref[0] = out.astype(o_ref.dtype)


def _pick_tq(T):
    if T <= 512:
        return T
    for cand in (512, 256, 128):
        if T % cand == 0:
            return cand
    return T


def mha_layernorm(x, mask, params):
    """x: (B, T, D); mask: additive, broadcastable to (1 or B, 1, T, T)."""
    B, T, D = x.shape
    H = params["n_heads"]
    d_k = D // H
    cdt = params["wqkv"].dtype
    approx_recip = bool(jnp.dtype(cdt) != jnp.dtype(jnp.float32))

    # Normalize the additive mask to (1 or B, 1, T, T); never broadcast over batch —
    # the constant index_map keeps it VMEM-resident instead of a per-step DMA.
    m = jnp.asarray(mask, jnp.float32)
    while m.ndim < 4:
        m = m[None]
    mB = m.shape[0]
    m = jnp.broadcast_to(m, (mB, 1, T, T))
    mask_map = (lambda b, qi: (0, 0, qi, 0)) if mB == 1 else (lambda b, qi: (b, 0, qi, 0))

    tq = _pick_tq(T)
    nq = T // tq

    wsize = jnp.dtype(cdt).itemsize
    xsize = jnp.dtype(x.dtype).itemsize
    cost = pl.CostEstimate(
        flops=int(2 * B * T * D * (4 * D + 2 * T)),
        transcendentals=int(B * H * T * T),
        bytes_accessed=int(2 * B * T * D * xsize + mB * T * T * 4 + 4 * D * D * wsize),
    )

    kernel = functools.partial(_mha_ln_kernel, H, d_k, tq, approx_recip)
    return pl.pallas_call(
        kernel,
        out_shape=jax.ShapeDtypeStruct((B, T, D), x.dtype),
        grid_spec=pltpu.PrefetchScalarGridSpec(
            num_scalar_prefetch=0,
            grid=(B, nq),
            in_specs=[
                pl.BlockSpec((1, T, D), lambda b, qi: (b, 0, 0)),     # x (resident across q-tiles)
                pl.BlockSpec((1, 1, tq, T), mask_map),                # additive mask (q-tile rows)
                _spec((D, 3 * D), lambda b, qi: (0, 0), single_buffer=True),  # [Wq/temp|Wk|Wv]^T
                _spec((D, D), lambda b, qi: (0, 0), single_buffer=True),      # Wfc^T
                _spec((1, D), lambda b, qi: (0, 0), single_buffer=True),      # LN1 gamma (f32)
                _spec((1, D), lambda b, qi: (0, 0), single_buffer=True),      # LN1 beta  (f32)
            ],
            out_specs=pl.BlockSpec((1, tq, D), lambda b, qi: (b, qi, 0)),
            scratch_shapes=[
                pltpu.VMEM((T, D), cdt),    # K cache (per batch element)
                pltpu.VMEM((T, D), cdt),    # V cache
                pltpu.VMEM((tq, D), cdt),   # concatenated head outputs
            ],
        ),
        compiler_params=pltpu.CompilerParams(
            dimension_semantics=("parallel", "arbitrary"),
            vmem_limit_bytes=_vmem_limit_bytes(),
        ),
        cost_estimate=cost,
    )(x, m, params["wqkv"], params["wo"], params["ln1_g"], params["ln1_b"])


# ----------------------------------------------------------------------------- #
# Kernel 2: position-wise FFN (Linear -> ReLU -> Linear) + residual + LayerNorm
# grid = (row tiles, d_inner tiles); f32 accumulator over the d_inner reduction
# ----------------------------------------------------------------------------- #
def _ffn_ln_kernel(x_ref, w1_ref, b1_ref, w2_ref, b2_ref, g_ref, b_ref,
                   o_ref, acc_ref):
    j = pl.program_id(1)

    @pl.when(j == 0)
    def _():
        acc_ref[...] = jnp.zeros_like(acc_ref)

    x = x_ref[...]                                                    # (tile, D)
    h = jnp.dot(x, w1_ref[...], preferred_element_type=jnp.float32) + b1_ref[...]
    h = jnp.maximum(h, 0.0).astype(w2_ref.dtype)                      # ReLU fused with downcast
    acc_ref[...] += jnp.dot(h, w2_ref[...], preferred_element_type=jnp.float32)

    @pl.when(j == pl.num_programs(1) - 1)
    def _():
        y = acc_ref[...] + b2_ref[...]
        out = _layer_norm_f32(x.astype(jnp.float32) + y, g_ref[...], b_ref[...])
        o_ref[...] = out.astype(o_ref.dtype)


def _pick_inner_tile(D, d_inner, wbytes, budget=8 * 1024 * 1024):
    """Largest d_inner tile (multiple of 128 divisor) whose W1/W2 tile fits the budget."""
    if D * d_inner * wbytes <= budget:
        return d_inner
    tn = max(128, int(budget // (D * wbytes)) // 128 * 128)
    while tn >= 128:
        if d_inner % tn == 0:
            return tn
        tn -= 128
    return d_inner


def ffn_layernorm(x, params, *, row_tile=None):
    B, T, D = x.shape
    d_inner = params["w1"].shape[1]
    rows = B * T
    cdt = params["w1"].dtype
    wsize = jnp.dtype(cdt).itemsize

    if row_tile is None:
        # 128 MiB chips (v5e/v6e) take the larger row tile; 64 MiB (v7x) the smaller one.
        row_tile = 1024 if _tpu_vmem_bytes() >= 96 * 1024 * 1024 else 512

    sub = 8 if x.dtype == jnp.float32 else 16
    tile = max(sub, min(_round_up(row_tile, sub), _round_up(rows, sub)))
    rows_p = _round_up(rows, tile)                                    # ragged tail -> pad

    tn = _pick_inner_tile(D, d_inner, wsize)
    n_inner = d_inner // tn
    const_w = n_inner == 1        # weights grid-invariant -> single-buffer them

    x2 = x.reshape(rows, D)
    if rows_p != rows:
        x2 = jnp.pad(x2, ((0, rows_p - rows), (0, 0)))
    # Note: padded rows go through LayerNorm (var ~ 0) but are sliced away below.

    xsize = jnp.dtype(x.dtype).itemsize
    cost = pl.CostEstimate(
        flops=int(4 * rows_p * D * d_inner),
        transcendentals=0,
        bytes_accessed=int(2 * rows_p * D * xsize + 2 * D * d_inner * wsize),
    )

    out2 = pl.pallas_call(
        _ffn_ln_kernel,
        out_shape=jax.ShapeDtypeStruct((rows_p, D), x.dtype),
        grid_spec=pltpu.PrefetchScalarGridSpec(
            num_scalar_prefetch=0,
            grid=(rows_p // tile, n_inner),
            in_specs=[
                pl.BlockSpec((tile, D), lambda i, j: (i, 0)),                   # x tile (resident over j)
                _spec((D, tn), lambda i, j: (0, j), single_buffer=const_w),     # W1^T tile
                _spec((1, tn), lambda i, j: (0, j), single_buffer=const_w),     # b1 tile (f32)
                _spec((tn, D), lambda i, j: (j, 0), single_buffer=const_w),     # W2^T tile
                _spec((1, D), lambda i, j: (0, 0), single_buffer=True),         # b2 (f32)
                _spec((1, D), lambda i, j: (0, 0), single_buffer=True),         # LN2 gamma
                _spec((1, D), lambda i, j: (0, 0), single_buffer=True),         # LN2 beta
            ],
            out_specs=pl.BlockSpec((tile, D), lambda i, j: (i, 0)),
            scratch_shapes=[pltpu.VMEM((tile, D), jnp.float32)],                # acc over d_inner
        ),
        compiler_params=pltpu.CompilerParams(
            dimension_semantics=("parallel", "arbitrary"),
            vmem_limit_bytes=_vmem_limit_bytes(),
        ),
        cost_estimate=cost,
    )(x2, params["w1"], params["b1"], params["w2"], params["b2"],
      params["ln2_g"], params["ln2_b"])

    return out2[:rows].reshape(B, T, D)


def transformer_block(x, mask, params, *, row_tile=None):
    """Forward pass of the PyTorch TransformerBlock (inference path)."""
    attn_out = mha_layernorm(x, mask, params)
    return ffn_layernorm(attn_out, params, row_tile=row_tile)


# ----------------------------------------------------------------------------- #
# Parameters (raw = PyTorch-equivalent, kernel = fused/scaled/cast) and reference
# ----------------------------------------------------------------------------- #
def init_raw_params(key, d_model, n_heads, d_inner):
    assert d_model % n_heads == 0
    ks = jax.random.split(key, 8)

    def w(k, fan_in, fan_out):
        # Stored as (in_features, out_features) == W_pytorch.T (transpose paid once here).
        return jax.random.normal(k, (fan_in, fan_out), jnp.float32) / math.sqrt(fan_in)

    return {
        "n_heads": n_heads,
        "wq": w(ks[0], d_model, d_model),
        "wk": w(ks[1], d_model, d_model),
        "wv": w(ks[2], d_model, d_model),
        "wo": w(ks[3], d_model, d_model),
        "w1": w(ks[4], d_model, d_inner),
        "b1": 0.1 * jax.random.normal(ks[5], (1, d_inner), jnp.float32),
        "w2": w(ks[6], d_inner, d_model),
        "b2": 0.1 * jax.random.normal(ks[7], (1, d_model), jnp.float32),
        "ln1_g": jnp.ones((1, d_model), jnp.float32),
        "ln1_b": jnp.zeros((1, d_model), jnp.float32),
        "ln2_g": jnp.ones((1, d_model), jnp.float32),
        "ln2_b": jnp.zeros((1, d_model), jnp.float32),
    }


def prepare_kernel_params(raw, compute_dtype=jnp.float32):
    """Kernel layout: fused [Wq/sqrt(d_k) | Wk | Wv]^T, big matrices cast to compute
    dtype; biases / LayerNorm params stay f32.  Cost paid once at load time."""
    H = raw["n_heads"]
    D = raw["wq"].shape[0]
    d_k = D // H
    inv_temp = 1.0 / math.sqrt(d_k)
    wqkv = jnp.concatenate([raw["wq"] * inv_temp, raw["wk"], raw["wv"]], axis=1)
    out = {
        "n_heads": H,
        "wqkv": wqkv.astype(compute_dtype),
        "wo": raw["wo"].astype(compute_dtype),
        "w1": raw["w1"].astype(compute_dtype),
        "w2": raw["w2"].astype(compute_dtype),
    }
    for k in ("b1", "b2", "ln1_g", "ln1_b", "ln2_g", "ln2_b"):
        out[k] = raw[k].astype(jnp.float32)
    return out


def reference_transformer_block(x, mask, raw):
    """Pure-JAX f32 reference matching the PyTorch forward (eval mode)."""
    H = raw["n_heads"]
    B, T, D = x.shape
    d_k = D // H
    xf = x.astype(jnp.float32)

    def ln(z, g, b):
        mu = jnp.mean(z, -1, keepdims=True)
        var = jnp.mean(jnp.square(z - mu), -1, keepdims=True)
        return (z - mu) * jax.lax.rsqrt(var + _LN_EPS) * g + b

    q = xf @ raw["wq"]
    k = xf @ raw["wk"]
    v = xf @ raw["wv"]

    def split(z):
        return z.reshape(B, T, H, d_k).transpose(0, 2, 1, 3)

    qh, kh, vh = split(q), split(k), split(v)
    s = jnp.einsum("bhqd,bhkd->bhqk", qh, kh) / math.sqrt(d_k) + mask.astype(jnp.float32)
    p = jax.nn.softmax(s, axis=-1)
    ctx = jnp.einsum("bhqk,bhkd->bhqd", p, vh).transpose(0, 2, 1, 3).reshape(B, T, D)
    a = ln(xf + ctx @ raw["wo"], raw["ln1_g"], raw["ln1_b"])
    h = jnp.maximum(a @ raw["w1"] + raw["b1"], 0.0)
    y = h @ raw["w2"] + raw["b2"]
    return ln(a + y, raw["ln2_g"], raw["ln2_b"])


if __name__ == "__main__":
    B, T, D_MODEL, N_HEADS, D_INNER = 2, 8, 32, 4, 64

    key = jax.random.PRNGKey(0)
    kx, kp = jax.random.split(key)
    x = jax.random.normal(kx, (B, T, D_MODEL), jnp.float32)
    raw = init_raw_params(kp, D_MODEL, N_HEADS, D_INNER)

    # Additive attention mask: 0 allowed, -1e9 disallowed (causal), shared by heads/batch.
    causal = jnp.tril(jnp.ones((T, T), jnp.float32))
    mask = jnp.where(causal[None, None] > 0, 0.0, -1e9).astype(jnp.float32)  # (1, 1, T, T)

    ref = reference_transformer_block(x, mask, raw)

    # f32 path (matches PyTorch fp32 numerics).
    out = transformer_block(x, mask, prepare_kernel_params(raw, jnp.float32))
    out = jax.block_until_ready(out)
    assert out.shape == (B, T, D_MODEL)
    assert jnp.allclose(out, ref, atol=2e-4, rtol=2e-4), "f32 kernel mismatch vs reference"

    # bf16 path (performance config: bf16 MXU operands, f32 accumulation in-kernel).
    out_bf16 = transformer_block(x.astype(jnp.bfloat16), mask,
                                 prepare_kernel_params(raw, jnp.bfloat16))
    out_bf16 = jax.block_until_ready(out_bf16).astype(jnp.float32)
    assert jnp.allclose(out_bf16, ref, atol=2e-1, rtol=1e-1), "bf16 kernel mismatch vs reference"

    print("KERNEL_OK")
</pallas_src>

<mosaic_0001>
module attributes {stable_mosaic.version = 11 : i64} {
  func.func @_mha_ln_kernel(%arg0: i32, %arg1: i32, %arg2: memref<1x8x32xf32, #tpu.memory_space<vmem>>, %arg3: memref<1x1x8x8xf32, #tpu.memory_space<vmem>>, %arg4: memref<32x96xf32, #tpu.memory_space<vmem>>, %arg5: memref<32x32xf32, #tpu.memory_space<vmem>>, %arg6: memref<1x32xf32, #tpu.memory_space<vmem>>, %arg7: memref<1x32xf32, #tpu.memory_space<vmem>>, %arg8: memref<1x8x32xf32, #tpu.memory_space<vmem>>, %arg9: memref<8x32xf32, #tpu.memory_space<vmem>>, %arg10: memref<8x32xf32, #tpu.memory_space<vmem>>, %arg11: memref<8x32xf32, #tpu.memory_space<vmem>>) attributes {dimension_semantics = [#tpu.dimension_semantics<parallel>, #tpu.dimension_semantics<arbitrary>], iteration_bounds = array<i64: 2, 1>, scalar_prefetch = 0 : i64, scratch_operands = 3 : i64, tpu.core_type = #tpu.core_type<tc>, window_params = [{transform_indices = @transform_0, window_bounds = array<i64: 1, 8, 32>}, {transform_indices = @transform_1, window_bounds = array<i64: 1, 1, 8, 8>}, {pipeline_mode = #tpu.pipeline_mode<synchronous>, transform_indices = @transform_2, window_bounds = array<i64: 32, 96>}, {pipeline_mode = #tpu.pipeline_mode<synchronous>, transform_indices = @transform_3, window_bounds = array<i64: 32, 32>}, {pipeline_mode = #tpu.pipeline_mode<synchronous>, transform_indices = @transform_4, window_bounds = array<i64: 1, 32>}, {pipeline_mode = #tpu.pipeline_mode<synchronous>, transform_indices = @transform_5, window_bounds = array<i64: 1, 32>}, {transform_indices = @transform_6, window_bounds = array<i64: 1, 8, 32>}]} {
    %c0_i32 = arith.constant 0 : i32
    %0 = arith.cmpi eq, %arg1, %c0_i32 : i32
    %1 = arith.extui %0 : i1 to i32
    %c0_i32_0 = arith.constant 0 : i32
    %2 = arith.cmpi ne, %1, %c0_i32_0 : i32
    scf.if %2 {
      %c0_62 = arith.constant 0 : index
      %c0_63 = arith.constant 0 : index
      %c0_64 = arith.constant 0 : index
      %111 = vector.load %arg2[%c0_62, %c0_63, %c0_64] : memref<1x8x32xf32, #tpu.memory_space<vmem>>, vector<1x8x32xf32>
      %112 = vector.shape_cast %111 : vector<1x8x32xf32> to vector<8x32xf32>
      %c0_65 = arith.constant 0 : index
      %c32 = arith.constant 32 : index
      %113 = vector.load %arg4[%c0_65, %c32] : memref<32x96xf32, #tpu.memory_space<vmem>>, vector<32x64xf32>
      %cst_66 = arith.constant dense<0.000000e+00> : vector<8x64xf32>
      %114 = tpu.matmul %112, %113, %cst_66 {dimension_numbers = #tpu.dot_dimension_numbers<[1], [0], [0], [1], [0, 0, 1, 1], [], []>} : vector<8x32xf32>, vector<32x64xf32>, vector<8x64xf32> -> vector<8x64xf32>
      %115 = vector.extract_strided_slice %114 {offsets = [0, 0], sizes = [8, 32], strides = [1, 1]} : vector<8x64xf32> to vector<8x32xf32>
      %c0_67 = arith.constant 0 : index
      %c0_68 = arith.constant 0 : index
      %116 = vector.load %arg9[%c0_67, %c0_68] : memref<8x32xf32, #tpu.memory_space<vmem>>, vector<8x32xf32>
      tpu.vector_store %arg9[%c0_67, %c0_68], %115 {strides = array<i32>} : memref<8x32xf32, #tpu.memory_space<vmem>>, vector<8x32xf32>,
      %117 = vector.extract_strided_slice %114 {offsets = [0, 32], sizes = [8, 32], strides = [1, 1]} : vector<8x64xf32> to vector<8x32xf32>
      %c0_69 = arith.constant 0 : index
      %c0_70 = arith.constant 0 : index
      %118 = vector.load %arg10[%c0_69, %c0_70] : memref<8x32xf32, #tpu.memory_space<vmem>>, vector<8x32xf32>
      tpu.vector_store %arg10[%c0_69, %c0_70], %117 {strides = array<i32>} : memref<8x32xf32, #tpu.memory_space<vmem>>, vector<8x32xf32>,
    } else {
    }
    %c8_i32 = arith.constant 8 : i32
    %3 = arith.muli %arg1, %c8_i32 : i32
    %4 = tpu.assume_multiple %3, 8 : i32
    %c0 = arith.constant 0 : index
    %5 = arith.index_cast %4 : i32 to index
    %c0_1 = arith.constant 0 : index
    %6 = vector.load %arg2[%c0, %5, %c0_1] : memref<1x8x32xf32, #tpu.memory_space<vmem>>, vector<1x8x32xf32>
    %7 = vector.shape_cast %6 : vector<1x8x32xf32> to vector<8x32xf32>
    %c0_2 = arith.constant 0 : index
    %c0_3 = arith.constant 0 : index
    %8 = vector.load %arg4[%c0_2, %c0_3] : memref<32x96xf32, #tpu.memory_space<vmem>>, vector<32x32xf32>
    %cst = arith.constant dense<0.000000e+00> : vector<8x32xf32>
    %9 = tpu.matmul %7, %8, %cst {dimension_numbers = #tpu.dot_dimension_numbers<[1], [0], [0], [1], [0, 0, 1, 1], [], []>} : vector<8x32xf32>, vector<32x32xf32>, vector<8x32xf32> -> vector<8x32xf32>
    %c0_4 = arith.constant 0 : index
    %c0_5 = arith.constant 0 : index
    %c0_6 = arith.constant 0 : index
    %c0_7 = arith.constant 0 : index
    %10 = vector.load %arg3[%c0_4, %c0_5, %c0_6, %c0_7] : memref<1x1x8x8xf32, #tpu.memory_space<vmem>>, vector<1x1x8x8xf32>
    %11 = vector.shape_cast %10 : vector<1x1x8x8xf32> to vector<8x8xf32>
    %12 = vector.extract_strided_slice %9 {offsets = [0, 0], sizes = [8, 8], strides = [1, 1]} : vector<8x32xf32> to vector<8x8xf32>
    %c0_8 = arith.constant 0 : index
    %c0_9 = arith.constant 0 : index
    %13 = vector.load %arg9[%c0_8, %c0_9] : memref<8x32xf32, #tpu.memory_space<vmem>>, vector<8x8xf32>
    %cst_10 = arith.constant dense<0.000000e+00> : vector<8x8xf32>
    %14 = tpu.matmul %12, %13, %cst_10 {dimension_numbers = #tpu.dot_dimension_numbers<[1], [1], [0], [0], [0, 0, 1, 0], [], []>} : vector<8x8xf32>, vector<8x8xf32>, vector<8x8xf32> -> vector<8x8xf32>
    %15 = arith.addf %14, %11 : vector<8x8xf32>
    %cst_11 = arith.constant dense<0xFF800000> : vector<8xf32>
    %16 = vector.multi_reduction <maximumf>, %15, %cst_11 [1] : vector<8x8xf32> to vector<8xf32>
    %17 = vector.shape_cast %16 : vector<8xf32> to vector<8x1xf32>
    %18 = vector.broadcast %17 : vector<8x1xf32> to vector<8x8xf32>
    %19 = arith.subf %15, %18 : vector<8x8xf32>
    %20 = math.exp %19 : vector<8x8xf32>
    %cst_12 = arith.constant dense<0.000000e+00> : vector<8xf32>
    %21 = vector.multi_reduction <add>, %20, %cst_12 [1] : vector<8x8xf32> to vector<8xf32>
    %22 = vector.shape_cast %21 : vector<8xf32> to vector<8x1xf32>
    %23 = tpu.reciprocal %22 : vector<8x1xf32> -> vector<8x1xf32>
    %24 = vector.broadcast %23 : vector<8x1xf32> to vector<8x8xf32>
    %25 = arith.mulf %20, %24 : vector<8x8xf32>
    %c0_13 = arith.constant 0 : index
    %c0_14 = arith.constant 0 : index
    %26 = vector.load %arg10[%c0_13, %c0_14] : memref<8x32xf32, #tpu.memory_space<vmem>>, vector<8x8xf32>
    %cst_15 = arith.constant dense<0.000000e+00> : vector<8x8xf32>
    %27 = tpu.matmul %25, %26, %cst_15 {dimension_numbers = #tpu.dot_dimension_numbers<[1], [0], [0], [1], [0, 0, 1, 1], [], []>} : vector<8x8xf32>, vector<8x8xf32>, vector<8x8xf32> -> vector<8x8xf32>
    %c0_16 = arith.constant 0 : index
    %c0_17 = arith.constant 0 : index
    %28 = vector.load %arg11[%c0_16, %c0_17] : memref<8x32xf32, #tpu.memory_space<vmem>>, vector<8x8xf32>
    tpu.vector_store %arg11[%c0_16, %c0_17], %27 {strides = array<i32>} : memref<8x32xf32, #tpu.memory_space<vmem>>, vector<8x8xf32>,
    %29 = vector.extract_strided_slice %9 {offsets = [0, 8], sizes = [8, 8], strides = [1, 1]} : vector<8x32xf32> to vector<8x8xf32>
    %c0_18 = arith.constant 0 : index
    %c8 = arith.constant 8 : index
    %30 = vector.load %arg9[%c0_18, %c8] : memref<8x32xf32, #tpu.memory_space<vmem>>, vector<8x8xf32>
    %cst_19 = arith.constant dense<0.000000e+00> : vector<8x8xf32>
    %31 = tpu.matmul %29, %30, %cst_19 {dimension_numbers = #tpu.dot_dimension_numbers<[1], [1], [0], [0], [0, 0, 1, 0], [], []>} : vector<8x8xf32>, vector<8x8xf32>, vector<8x8xf32> -> vector<8x8xf32>
    %32 = arith.addf %31, %11 : vector<8x8xf32>
    %cst_20 = arith.constant dense<0xFF800000> : vector<8xf32>
    %33 = vector.multi_reduction <maximumf>, %32, %cst_20 [1] : vector<8x8xf32> to vector<8xf32>
    %34 = vector.shape_cast %33 : vector<8xf32> to vector<8x1xf32>
    %35 = vector.broadcast %34 : vector<8x1xf32> to vector<8x8xf32>
    %36 = arith.subf %32, %35 : vector<8x8xf32>
    %37 = math.exp %36 : vector<8x8xf32>
    %cst_21 = arith.constant dense<0.000000e+00> : vector<8xf32>
    %38 = vector.multi_reduction <add>, %37, %cst_21 [1] : vector<8x8xf32> to vector<8xf32>
    %39 = vector.shape_cast %38 : vector<8xf32> to vector<8x1xf32>
    %40 = tpu.reciprocal %39 : vector<8x1xf32> -> vector<8x1xf32>
    %41 = vector.broadcast %40 : vector<8x1xf32> to vector<8x8xf32>
    %42 = arith.mulf %37, %41 : vector<8x8xf32>
    %c0_22 = arith.constant 0 : index
    %c8_23 = arith.constant 8 : index
    %43 = vector.load %arg10[%c0_22, %c8_23] : memref<8x32xf32, #tpu.memory_space<vmem>>, vector<8x8xf32>
    %cst_24 = arith.constant dense<0.000000e+00> : vector<8x8xf32>
    %44 = tpu.matmul %42, %43, %cst_24 {dimension_numbers = #tpu.dot_dimension_numbers<[1], [0], [0], [1], [0, 0, 1, 1], [], []>} : vector<8x8xf32>, vector<8x8xf32>, vector<8x8xf32> -> vector<8x8xf32>
    %c0_25 = arith.constant 0 : index
    %c8_26 = arith.constant 8 : index
    %45 = vector.load %arg11[%c0_25, %c8_26] : memref<8x32xf32, #tpu.memory_space<vmem>>, vector<8x8xf32>
    tpu.vector_store %arg11[%c0_25, %c8_26], %44 {strides = array<i32>} : memref<8x32xf32, #tpu.memory_space<vmem>>, vector<8x8xf32>,
    %46 = vector.extract_strided_slice %9 {offsets = [0, 16], sizes = [8, 8], strides = [1, 1]} : vector<8x32xf32> to vector<8x8xf32>
    %c0_27 = arith.constant 0 : index
    %c16 = arith.constant 16 : index
    %47 = vector.load %arg9[%c0_27, %c16] : memref<8x32xf32, #tpu.memory_space<vmem>>, vector<8x8xf32>
    %cst_28 = arith.constant dense<0.000000e+00> : vector<8x8xf32>
    %48 = tpu.matmul %46, %47, %cst_28 {dimension_numbers = #tpu.dot_dimension_numbers<[1], [1], [0], [0], [0, 0, 1, 0], [], []>} : vector<8x8xf32>, vector<8x8xf32>, vector<8x8xf32> -> vector<8x8xf32>
    %49 = arith.addf %48, %11 : vector<8x8xf32>
    %cst_29 = arith.constant dense<0xFF800000> : vector<8xf32>
    %50 = vector.multi_reduction <maximumf>, %49, %cst_29 [1] : vector<8x8xf32> to vector<8xf32>
    %51 = vector.shape_cast %50 : vector<8xf32> to vector<8x1xf32>
    %52 = vector.broadcast %51 : vector<8x1xf32> to vector<8x8xf32>
    %53 = arith.subf %49, %52 : vector<8x8xf32>
    %54 = math.exp %53 : vector<8x8xf32>
    %cst_30 = arith.constant dense<0.000000e+00> : vector<8xf32>
    %55 = vector.multi_reduction <add>, %54, %cst_30 [1] : vector<8x8xf32> to vector<8xf32>
    %56 = vector.shape_cast %55 : vector<8xf32> to vector<8x1xf32>
    %57 = tpu.reciprocal %56 : vector<8x1xf32> -> vector<8x1xf32>
    %58 = vector.broadcast %57 : vector<8x1xf32> to vector<8x8xf32>
    %59 = arith.mulf %54, %58 : vector<8x8xf32>
    %c0_31 = arith.constant 0 : index
    %c16_32 = arith.constant 16 : index
    %60 = vector.load %arg10[%c0_31, %c16_32] : memref<8x32xf32, #tpu.memory_space<vmem>>, vector<8x8xf32>
    %cst_33 = arith.constant dense<0.000000e+00> : vector<8x8xf32>
    %61 = tpu.matmul %59, %60, %cst_33 {dimension_numbers = #tpu.dot_dimension_numbers<[1], [0], [0], [1], [0, 0, 1, 1], [], []>} : vector<8x8xf32>, vector<8x8xf32>, vector<8x8xf32> -> vector<8x8xf32>
    %c0_34 = arith.constant 0 : index
    %c16_35 = arith.constant 16 : index
    %62 = vector.load %arg11[%c0_34, %c16_35] : memref<8x32xf32, #tpu.memory_space<vmem>>, vector<8x8xf32>
    tpu.vector_store %arg11[%c0_34, %c16_35], %61 {strides = array<i32>} : memref<8x32xf32, #tpu.memory_space<vmem>>, vector<8x8xf32>,
    %63 = vector.extract_strided_slice %9 {offsets = [0, 24], sizes = [8, 8], strides = [1, 1]} : vector<8x32xf32> to vector<8x8xf32>
    %c0_36 = arith.constant 0 : index
    %c24 = arith.constant 24 : index
    %64 = vector.load %arg9[%c0_36, %c24] : memref<8x32xf32, #tpu.memory_space<vmem>>, vector<8x8xf32>
    %cst_37 = arith.constant dense<0.000000e+00> : vector<8x8xf32>
    %65 = tpu.matmul %63, %64, %cst_37 {dimension_numbers = #tpu.dot_dimension_numbers<[1], [1], [0], [0], [0, 0, 1, 0], [], []>} : vector<8x8xf32>, vector<8x8xf32>, vector<8x8xf32> -> vector<8x8xf32>
    %66 = arith.addf %65, %11 : vector<8x8xf32>
    %cst_38 = arith.constant dense<0xFF800000> : vector<8xf32>
    %67 = vector.multi_reduction <maximumf>, %66, %cst_38 [1] : vector<8x8xf32> to vector<8xf32>
    %68 = vector.shape_cast %67 : vector<8xf32> to vector<8x1xf32>
    %69 = vector.broadcast %68 : vector<8x1xf32> to vector<8x8xf32>
    %70 = arith.subf %66, %69 : vector<8x8xf32>
    %71 = math.exp %70 : vector<8x8xf32>
    %cst_39 = arith.constant dense<0.000000e+00> : vector<8xf32>
    %72 = vector.multi_reduction <add>, %71, %cst_39 [1] : vector<8x8xf32> to vector<8xf32>
    %73 = vector.shape_cast %72 : vector<8xf32> to vector<8x1xf32>
    %74 = tpu.reciprocal %73 : vector<8x1xf32> -> vector<8x1xf32>
    %75 = vector.broadcast %74 : vector<8x1xf32> to vector<8x8xf32>
    %76 = arith.mulf %71, %75 : vector<8x8xf32>
    %c0_40 = arith.constant 0 : index
    %c24_41 = arith.constant 24 : index
    %77 = vector.load %arg10[%c0_40, %c24_41] : memref<8x32xf32, #tpu.memory_space<vmem>>, vector<8x8xf32>
    %cst_42 = arith.constant dense<0.000000e+00> : vector<8x8xf32>
    %78 = tpu.matmul %76, %77, %cst_42 {dimension_numbers = #tpu.dot_dimension_numbers<[1], [0], [0], [1], [0, 0, 1, 1], [], []>} : vector<8x8xf32>, vector<8x8xf32>, vector<8x8xf32> -> vector<8x8xf32>
    %c0_43 = arith.constant 0 : index
    %c24_44 = arith.constant 24 : index
    %79 = vector.load %arg11[%c0_43, %c24_44] : memref<8x32xf32, #tpu.memory_space<vmem>>, vector<8x8xf32>
    tpu.vector_store %arg11[%c0_43, %c24_44], %78 {strides = array<i32>} : memref<8x32xf32, #tpu.memory_space<vmem>>, vector<8x8xf32>,
    %c0_45 = arith.constant 0 : index
    %c0_46 = arith.constant 0 : index
    %80 = vector.load %arg11[%c0_45, %c0_46] : memref<8x32xf32, #tpu.memory_space<vmem>>, vector<8x32xf32>
    %c0_47 = arith.constant 0 : index
    %c0_48 = arith.constant 0 : index
    %81 = vector.load %arg5[%c0_47, %c0_48] : memref<32x32xf32, #tpu.memory_space<vmem>>, vector<32x32xf32>
    %cst_49 = arith.constant dense<0.000000e+00> : vector<8x32xf32>
    %82 = tpu.matmul %80, %81, %cst_49 {dimension_numbers = #tpu.dot_dimension_numbers<[1], [0], [0], [1], [0, 0, 1, 1], [], []>} : vector<8x32xf32>, vector<32x32xf32>, vector<8x32xf32> -> vector<8x32xf32>
    %83 = arith.addf %7, %82 : vector<8x32xf32>
    %c0_50 = arith.constant 0 : index
    %c0_51 = arith.constant 0 : index
    %84 = vector.load %arg6[%c0_50, %c0_51] : memref<1x32xf32, #tpu.memory_space<vmem>>, vector<1x32xf32>
    %c0_52 = arith.constant 0 : index
    %c0_53 = arith.constant 0 : index
    %85 = vector.load %arg7[%c0_52, %c0_53] : memref<1x32xf32, #tpu.memory_space<vmem>>, vector<1x32xf32>
    %cst_54 = arith.constant dense<0.000000e+00> : vector<8xf32>
    %86 = vector.multi_reduction <add>, %83, %cst_54 [1] : vector<8x32xf32> to vector<8xf32>
    %87 = vector.shape_cast %86 : vector<8xf32> to vector<8x1xf32>
    %cst_55 = arith.constant 3.200000e+01 : f32
    %88 = vector.broadcast %cst_55 : f32 to vector<8x1xf32>
    %89 = arith.divf %87, %88 : vector<8x1xf32>
    %90 = vector.broadcast %89 : vector<8x1xf32> to vector<8x32xf32>
    %91 = arith.subf %83, %90 : vector<8x32xf32>
    %92 = arith.mulf %91, %91 : vector<8x32xf32>
    %cst_56 = arith.constant dense<0.000000e+00> : vector<8xf32>
    %93 = vector.multi_reduction <add>, %92, %cst_56 [1] : vector<8x32xf32> to vector<8xf32>
    %94 = vector.shape_cast %93 : vector<8xf32> to vector<8x1xf32>
    %cst_57 = arith.constant 3.200000e+01 : f32
    %95 = vector.broadcast %cst_57 : f32 to vector<8x1xf32>
    %96 = arith.divf %94, %95 : vector<8x1xf32>
    %97 = vector.broadcast %89 : vector<8x1xf32> to vector<8x32xf32>
    %98 = arith.subf %83, %97 : vector<8x32xf32>
    %cst_58 = arith.constant 9.99999997E-7 : f32
    %99 = vector.broadcast %cst_58 : f32 to vector<8x1xf32>
    %100 = arith.addf %96, %99 : vector<8x1xf32>
    %101 = math.rsqrt %100 : vector<8x1xf32>
    %102 = vector.broadcast %101 : vector<8x1xf32> to vector<8x32xf32>
    %103 = arith.mulf %98, %102 : vector<8x32xf32>
    %104 = vector.broadcast %84 : vector<1x32xf32> to vector<8x32xf32>
    %105 = arith.mulf %103, %104 : vector<8x32xf32>
    %106 = vector.broadcast %85 : vector<1x32xf32> to vector<8x32xf32>
    %107 = arith.addf %105, %106 : vector<8x32xf32>
    %c0_59 = arith.constant 0 : index
    %c0_60 = arith.constant 0 : index
    %c0_61 = arith.constant 0 : index
    %108 = vector.load %arg8[%c0_59, %c0_60, %c0_61] : memref<1x8x32xf32, #tpu.memory_space<vmem>>, vector<1x8x32xf32>
    %109 = vector.shape_cast %108 : vector<1x8x32xf32> to vector<8x32xf32>
    %110 = vector.shape_cast %107 : vector<8x32xf32> to vector<1x8x32xf32>
    tpu.vector_store %arg8[%c0_59, %c0_60, %c0_61], %110 {strides = array<i32>} : memref<1x8x32xf32, #tpu.memory_space<vmem>>, vector<1x8x32xf32>,
    return
  }
  func.func @transform_0(%arg0: i32, %arg1: i32) -> (i32, i32, i32) {
    %c0_i32 = arith.constant 0 : i32
    %c0_i32_0 = arith.constant 0 : i32
    %c0_i32_1 = arith.constant 0 : i32
    return %arg0, %c0_i32, %c0_i32_0 : i32, i32, i32
  }
  func.func @transform_1(%arg0: i32, %arg1: i32) -> (i32, i32, i32, i32) {
    %c0_i32 = arith.constant 0 : i32
    %c0_i32_0 = arith.constant 0 : i32
    %c0_i32_1 = arith.constant 0 : i32
    %c0_i32_2 = arith.constant 0 : i32
    return %c0_i32, %c0_i32_0, %arg1, %c0_i32_1 : i32, i32, i32, i32
  }
  func.func @transform_2(%arg0: i32, %arg1: i32) -> (i32, i32) {
    %c0_i32 = arith.constant 0 : i32
    %c0_i32_0 = arith.constant 0 : i32
    %c0_i32_1 = arith.constant 0 : i32
    return %c0_i32, %c0_i32_0 : i32, i32
  }
  func.func @transform_3(%arg0: i32, %arg1: i32) -> (i32, i32) {
    %c0_i32 = arith.constant 0 : i32
    %c0_i32_0 = arith.constant 0 : i32
    %c0_i32_1 = arith.constant 0 : i32
    return %c0_i32, %c0_i32_0 : i32, i32
  }
  func.func @transform_4(%arg0: i32, %arg1: i32) -> (i32, i32) {
    %c0_i32 = arith.constant 0 : i32
    %c0_i32_0 = arith.constant 0 : i32
    %c0_i32_1 = arith.constant 0 : i32
    return %c0_i32, %c0_i32_0 : i32, i32
  }
  func.func @transform_5(%arg0: i32, %arg1: i32) -> (i32, i32) {
    %c0_i32 = arith.constant 0 : i32
    %c0_i32_0 = arith.constant 0 : i32
    %c0_i32_1 = arith.constant 0 : i32
    return %c0_i32, %c0_i32_0 : i32, i32
  }
  func.func @transform_6(%arg0: i32, %arg1: i32) -> (i32, i32, i32) {
    %c0_i32 = arith.constant 0 : i32
    %c0_i32_0 = arith.constant 0 : i32
    return %arg0, %arg1, %c0_i32 : i32, i32, i32
  }
}

</mosaic_0001>

<bundles_post_ra>
// kernel: tpu_custom_call.1
= control target key start
LH: loop header
LB: loop body
LE: loop exit
PB: predicated region body
PF: predicated region fallthrough
CT: control target
= control target key end

     0   :  { %s2238_s0 = inlined_call_operand.hbm [shape: f32[2,8,32], index: 0, kind: input, shape index: {}]   ;;  %s2239_s1 = inlined_call_operand.hbm [shape: f32[1,1,8,8], index: 1, kind: input, shape index: {}]   ;;  %s2240_s2 = inlined_call_operand.hbm [shape: f32[32,96], index: 2, kind: input, shape index: {}]   ;;  %s2241_s3 = inlined_call_operand.hbm [shape: f32[32,32], index: 3, kind: input, shape index: {}]   ;;  %s2242_s4 = inlined_call_operand.vmem [shape: f32[1,32], index: 4, kind: input, shape index: {}]   ;;  %s2243_s5 = inlined_call_operand.vmem [shape: f32[1,32], index: 5, kind: input, shape index: {}]   ;;  %s2244_s6 = inlined_call_operand.hbm [shape: f32[2,8,32], index: 6, kind: output, shape index: {}]  }
   0x1   :  { %2249 = sst [smem:[#allocation18_spill]] %s2239_s1 }
   0x2   :  { %2250 = sst [smem:[#allocation19_spill]] %s2240_s2 }
   0x3   :  { %11 = vsyncpa [#allocation6], 0 }
   0x4   :  { %13 = vsyncpa [#allocation6 + $0x1], 0 }
   0x5   :  { %14 = vsyncpa [#allocation9], 0 }
   0x6   :  { %15 = vsyncpa [#allocation12], 0 }
   0x7   :  { %16 = vsyncpa [#allocation7], 0 }
   0x8   :  { %18 = vsyncpa [#allocation7 + $0x1], 0  ;;  %s1952_s21 = smov 0   ;;  %s1954_s22 = smov 0  }
   0x9   :  { %s1956_s23 = smov 0   ;;  %s1958_s24 = smov 0  }
   0xa   :  { %s1960_s25 = smov 0   ;;  %s1962_s26 = smov 0  }
   0xb LB: > { %s1443_s27 = sadd.s32 4294967295, %s1899_s26   ;;  %s1444_s28 = sadd.s32 4294967294, %s1899_s26   ;;  %s1899_s26 = sphi %s1962_s26, %s24_s26   ;;  %s1895_s25 = sphi %s1960_s25, %s2271_s25   ;;  %s1891_s24 = sphi %s1958_s24, %s2270_s24   ;;  %s1887_s23 = sphi %s1956_s23, %s2269_s23   ;;  %s1883_s22 = sphi %s1954_s22, %s2268_s22   ;;  %s1879_s21 = sphi %s1952_s21, %s2267_s21  }
   0xc   : > { %p56_p0 = scmp.ne.s32.totalorder %s1883_s22, %s1879_s21  ;;  %p1986_p1 = scmp.eq.s32.totalorder %s1443_s27, 0 }
   0xd   : > { %p1990_p2 = scmp.eq.s32.totalorder %s1443_s27, 1  ;;  %p198_p3 = scmp.eq.s32.totalorder %s1444_s28, 1 }
   0xe   : > { %s2251_s29 = scalar_select %p1986_p1, 1, 0 }
   0xf   : > { %s2252_s30 = scalar_select %p1990_p2, 1, 0 }
  0x10   : > { %p1996_p4 = por %p1986_p1, %p56_p0  ;;  %p1445_p5 = scmp.ge.s32.totalorder %s1899_s26, 1 }
  0x11   : > { %p2001_p6 = por %p198_p3, %p56_p0  ;;  %p205_p7 = scmp.lt.s32.totalorder %s1899_s26, 3 }
  0x12   : > { %s2253_s7 = scalar_select %p1996_p4, 1, 0 }
  0x13   : > { %s2254_s8 = scalar_select %p2001_p6, 1, 0 }
  0x14   : > { %p2006_p8 = pnand %p1445_p5, %p205_p7  ;;  %s1901_s10 = smov [#allocation8]  }
  0x15   : > { %s220_s11 = sshll.u32 %s1901_s10, 4  ;;  %s1902_s12 = smov [#allocation10]   ;;  %s221_s11 = int_to_ptr.vmem [resolvable:$true] %s220_s11 }
  0x16   : > { %s2255_s9 = scalar_select %p2006_p8, 1, 0 }
  0x17   : > { %p1599_p10 = pneg %p2006_p8  ;;  %s230_s13 = sshll.u32 %s1902_s12, 4  ;;  %s231_s13 = int_to_ptr.vmem [resolvable:$true] %s230_s13 }
  0x18   : > { %s1903_s15 = smov [#allocation11]   ;;  %s1716_s17 = scalar_lea.vmem %s221_s11, 128 }
  0x19   : > { %p2015_p11 = pnand %p1599_p10, %p1986_p1  ;;  %s243_s16 = sshll.u32 %s1903_s15, 4  ;;  %s244_s16 = int_to_ptr.vmem [resolvable:$true] %s243_s16 }
  0x1a   : > { %p1717_p13 = scmp.ne.s32.totalorder %s221_s11, %s1716_s17  ;;  %p1724_p5 = scmp.lt.s32.totalorder %s221_s11, %s221_s11 }
  0x1b   : > { %p1707_p12 = pneg %p2015_p11  ;;  %p1725_p7 = scmp.lt.s32.totalorder %s1716_s17, %s1716_s17 }
  0x1d   : > { %p1719_p0 = pnand %p1717_p13, %p1707_p12  ;;  %p1726_p9 = por %p1725_p7, %p1724_p5 }
  0x1f   : > { %p1720_p3 = pneg %p1719_p0 }
  0x21   : > { %p1727_p10 = pnand %p1726_p9, %p1720_p3 }
  0x23   : > { %1730 = shalt.err (!%p1727_p10)
}
  0x24   : > { %s2257_s1 = sld [smem:[#allocation18_spill]]  ;;  %s1742_s20 = scalar_lea.vmem %s231_s13, 512 }
  0x25   : > { %p1743_p6 = scmp.ne.s32.totalorder %s231_s13, %s1742_s20  ;;  %p1750_p13 = scmp.lt.s32.totalorder %s231_s13, %s231_s13 }
  0x26   : > { %p1751_p0 = scmp.lt.s32.totalorder %s1742_s20, %s1742_s20 }
  0x27   : > { %p1745_p1 = pnand %p1743_p6, %p1707_p12 }
  0x28   : > { %p1752_p8 = por %p1751_p0, %p1750_p13 }
  0x29   : > { %p1746_p4 = pneg %p1745_p1 }
  0x2a   : > { %1602 = dma.hbm_to_vmem [thread:$0]  (!%p2015_p11), %s2257_s1, 128, %s221_s11, [#allocation9]  }
  0x2b   : > { %p1753_p2 = pnand %p1752_p8, %p1746_p4 }
  0x2d   : > { %1756 = shalt.err (!%p1753_p2)
}
  0x2e   : > { %s1904_s27 = smov 128   ;;  %s1905_s28 = smov 8  }
  0x2f   : > { %s2258_s2 = sld [smem:[#allocation19_spill]]  ;;  %s1768_s11 = scalar_lea.vmem %s244_s16, 512 }
  0x30   : > { %p1769_p9 = scmp.ne.s32.totalorder %s244_s16, %s1768_s11  ;;  %p1776_p3 = scmp.lt.s32.totalorder %s244_s16, %s244_s16 }
  0x31   : > { %p1777_p5 = scmp.lt.s32.totalorder %s1768_s11, %s1768_s11 }
  0x32   : > { %p1771_p1 = pnand %p1769_p9, %p1707_p12 }
  0x33   : > { %p1778_p4 = por %p1777_p5, %p1776_p3 }
  0x34   : > { %p1772_p6 = pneg %p1771_p1 }
  0x35   : > { %1605 = dma.hbm_to_vmem [thread:$0]  (!%p2015_p11), %s2258_s2, 512, %s231_s13, [#allocation9], %s1904_s27, %s1904_s27, %s1905_s28  }
  0x36   : > { %p1779_p2 = pnand %p1778_p4, %p1772_p6 }
  0x38   : > { %1782 = shalt.err (!%p1779_p2)
}
  0x39   : > { %1608 = dma.hbm_to_vmem [thread:$0]  (!%p2015_p11), %s2241_s3, 512, %s244_s16, [#allocation12], %s1904_s27, %s1904_s27, %s1905_s28  }
  0x3a   : > { %s43_s13 = sadd.s32 1, %s1887_s23  ;;  %s36_s18 = sadd.s32 1, %s1895_s25 }
  0x3b   : > { %p50_p8 = scmp.ne.s32.totalorder %s1887_s23, %s1883_s22  ;;  %p38_p12 = scmp.ge.s32.totalorder %s36_s18, 2 }
  0x3c   : > { %p51_p7 = scmp.eq.s32.totalorder %s1899_s26, 0  ;;  %p2259_p10 = scmp.ne.s32.totalorder %s2252_s30, 0 }
  0x3d   : > { %p1620_p0 = scmp.lt.s32.totalorder %s1899_s26, 2  ;;  %s2273_s18 = smov (%p38_p12, %s36_s18), 0 }
  0x3e   : > { %p2052_p13 = por %p2259_p10, %p50_p8  ;;  %p52_p9 = por %p51_p7, %p50_p8 }
  0x3f   : > { %s263_s19 = sand.u32 1, %s1887_s23   ;;  %s40_s20 = ssub.s32 %s1895_s25, %s2273_s18 }
  0x40   : > { %p41_p1 = scmp.eq.s32.totalorder %s40_s20, 0  ;;  %s1450_s16 = sshll.u32 %s263_s19, 3 }
  0x41   : > { %s1451_s27 = sshll.u32 %s1895_s25, 7  ;;  %s267_s11 = scalar_lea.vmem [#allocation5], %s1450_s16 }
  0x42   : > { %s2064_s28 = scalar_select %p41_p1, %s1887_s23, %s43_s13  }
  0x43   : > { %s272_s30 = scalar_lea.hbm %s2238_s0, %s1451_s27  ;;  %s274_s15 = sshll.u32 %s267_s11, 4  ;;  %s275_s15 = int_to_ptr.vmem [resolvable:$true] %s274_s15 }
  0x44   : > { %p2071_p11 = pnand %p1620_p0, %p52_p9  ;;  %s264_s1 = scalar_lea.sflag [#allocation6], %s263_s19 }
  0x45   : > { %s1796_s20 = scalar_lea.vmem %s275_s15, 128  ;;  %s1906_s13 = smov [#allocation5]  }
  0x46   : > { %p1785_p6 = pneg %p2071_p11  ;;  %p1797_p3 = scmp.ne.s32.totalorder %s275_s15, %s1796_s20 }
  0x47   : > { %s1801_s2 = sshll.u32 %s1906_s13, 4  ;;  %s1802_s2 = int_to_ptr.vmem [resolvable:$false] %s1801_s2 }
  0x48   : > { %p1799_p5 = pnand %p1797_p3, %p1785_p6  ;;  %s1803_s27 = scalar_lea.vmem %s1802_s2, 256 }
  0x49   : > { %p1804_p2 = scmp.lt.s32.totalorder %s275_s15, %s1802_s2  ;;  %p1805_p8 = scmp.lt.s32.totalorder %s1803_s27, %s1796_s20 }
  0x4a   : > { %p1800_p4 = pneg %p1799_p5 }
  0x4b   : > { %p1806_p12 = por %p1805_p8, %p1804_p2 }
  0x4d   : > { %p1807_p7 = pnand %p1806_p12, %p1800_p4 }
  0x4f   : > { %1810 = shalt.err (!%p1807_p7)
}
  0x50   : > { %1612 = dma.hbm_to_vmem [thread:$0]  (!%p2071_p11), %s272_s30, 128, %s275_s15, %s264_s1  }
  0x51   : > { %p2262_p10 = scmp.ne.s32.totalorder %s2255_s9, 0 }
  0x52   : > { %s2082_s19 = sand.u32 (!%p2262_p10), 1, %s1883_s22   ;;  %p2263_p0 = scmp.ne.s32.totalorder (!%p2262_p10), %s2253_s7, 0 }
  0x53   : > { %283 = sbr.rel (%p2262_p10) target bundleno = 1887 (0x75f), region = 44  ;;  %s1453_s16 = sshll.u32 (!%p2262_p10), %s2082_s19, 3 }
  0x54   : > { %s286_s10 = scalar_lea.sflag (!%p2262_p10), [#allocation6], %s2082_s19  ;;  %s289_s2 = scalar_lea.vmem (!%p2262_p10), [#allocation5], %s1453_s16 }
  0x58   : > { %1862 = dma.done.wait (%p2263_p0), %s286_s10, 128  }
  0x59   : > { %1864 = vsyncadd (%p2263_p0), %s286_s10, 4294967168  ;;  %p2264_p9 = scmp.ne.s32.totalorder %s2251_s29, 0 }
  0x5b   : > { %1866 = dma.done.wait (%p2264_p9), [#allocation9], 640  }
  0x5c   : > { %1868 = vsyncadd (%p2264_p9), [#allocation9], 4294966656 }
  0x5d   : > { %1870 = dma.done.wait (%p2264_p9), [#allocation12], 512  }
  0x5e   : > { %1872 = vsyncadd (%p2264_p9), [#allocation12], 4294966784  ;;  %v1907_v0 = vmov 0.0   ;;  %vm1908_vm0 = vmmov 0   ;;  %v338_v1 = vld [vmem:[#allocation10 + $0x18] sm:$0xff]  ;;  %v336_v2 = vld [vmem:[#allocation10 + $0x8] sm:$0xff] }
  0x5f   : > { %1510 = vmatprep.subr.mxu0 %v1907_v0  ;;  %1521 = vmatprep.subr.mxu1 %v1907_v0  ;;  %s1909_s1 = smov 96   ;;  %v337_v3 = vld [vmem:[#allocation10 + $0x10] sm:$0xff]  ;;  %v335_v4 = vld [vmem:[#allocation10] sm:$0xff]  ;;  %vm355_vm1 = vcmask 261120   ;;  %s1910_s29 = smov 120   ;;  %vm518_vm2 = vcmask 64512  }
  0x60   : > { %1518 = vmatprep.mubr.msk.f32.mxu0 %vm1908_vm0, %v1907_v0  ;;  %1529 = vmatprep.mubr.msk.f32.mxu1 %vm1908_vm0, %v1907_v0  ;;  %v2113_v5 = vld [vmem:[%s289_s2] sm:$0xff]  ;;  %s1911_s7 = smov 112   ;;  %s1912_s9 = smov 104   ;;  %v516_v21 = vld [vmem:[#allocation8] sm:$0xff]  ;;  %vm854_vm3 = vcmask 130112   ;;  %vm1029_vm4 = vcmask 195712  }
  0x61   : > { %349 = vrot.lane.b32.xlu0 %v338_v1, %s1909_s1  ;;  %345 = vrot.lane.b32.xlu1 %v336_v2, %s1909_s1  ;;  %s1913_s12 = smov 8   ;;  %s1914_s30 = smov 16   ;;  %vm1204_vm5 = vcmask 261312  }
  0x62   : > { %1522 = vmatpush3.msra.mxu1 %v338_v1  ;;  %s1915_s11 = smov 24   ;;  %s1476_s27 = sshll.u32 %s1891_s24, 7 }
  0x63   : > { %1523 = vmatprep.subr.mxu1 %v1907_v0  ;;  %s329_s10 = scalar_lea.vmem [#allocation13], %s1453_s16 }
  0x64   : > { %1524 = vmatpush3.msra.mxu1 %v337_v3  ;;  %s1331_s2 = sshll.u32 %s329_s10, 4  ;;  %s1332_s2 = int_to_ptr.vmem [resolvable:$true] %s1331_s2 }
  0x65   : > { %347 = vrot.lane.b32.xlu0 %v337_v3, %s1909_s1  ;;  %343 = vrot.lane.b32.xlu1 %v335_v4, %s1909_s1 }
  0x66   : > { %1525 = vmatprep.subr.mxu1 %v1907_v0 }
  0x67   : > { %1526 = vmatpush3.msra.mxu1 %v336_v2 }
  0x68   : > { %1527 = vmatprep.subr.mxu1 %v1907_v0 }
  0x69   : > { %1528 = vmatpush3.msra.mxu1 %v335_v4 }
  0x6a   : > { %1530 = vmatmul.mubr.msk.f32.vlgmr.msra.gmra.mxu1 %vm355_vm1, %v2113_v5  ;;  %1532 = vmatprep.subr.mxu1 %v1907_v0 }
  0x6b   : > { %1534 = vmatprep.mubr.msk.f32.mxu1 %vm1908_vm0, %v1907_v0 }
  0xd3   : > { %v350_v6 = vpop.permute.xlu0 %349  ;;  %v346_v7 = vpop.permute.xlu1 %345 }
  0xd4   : > { %1511 = vmatpush3.msra.mxu0 %v350_v6 }
  0xd5   : > { %1512 = vmatprep.subr.mxu0 %v1907_v0 }
  0xd7   : > { %v348_v8 = vpop.permute.xlu0 %347  ;;  %v344_v9 = vpop.permute.xlu1 %343 }
  0xd8   : > { %1513 = vmatpush3.msra.mxu0 %v348_v8 }
  0xd9   : > { %1514 = vmatprep.subr.mxu0 %v1907_v0 }
  0xda   : > { %1515 = vmatpush3.msra.mxu0 %v346_v7 }
  0xdb   : > { %1516 = vmatprep.subr.mxu0 %v1907_v0 }
  0xdc   : > { %1517 = vmatpush3.msra.mxu0 %v344_v9 }
  0xdd   : > { %1519 = vmatmul.mubr.msk.f32.vlgmr.msra.gmra.mxu0 %vm355_vm1, %v2113_v5  ;;  %1542 = vmatprep.subr.mxu0 %v1907_v0 }
  0xde   : > { %1544 = vmatprep.mubr.msk.f32.mxu0 %vm1908_vm0, %v1907_v0 }
 0x12a   : > { %v512_v10 = vpop.f32.mrf.mxu1 }
 0x12b   : > { %682 = vrot.lane.b32.xlu1 %v512_v10, %s1910_s29 }
 0x12c   : > { %v1531_v11 = vpop.f32.mrf.mxu1 }
 0x12f   : > { %857 = vrot.lane.b32.xlu1 %v512_v10, %s1911_s7 }
 0x133   : > { %1032 = vrot.lane.b32.xlu1 %v512_v10, %s1912_s9 }
 0x19d   : > { %v425_v12 = vpop.f32.mrf.mxu0  ;;  %v683_v15 = vpop.permute.xlu1 %682 }
 0x19e   : > { %429 = vst.msk [vmem:[#allocation2] sm:$0xff] %vm355_vm1, %v425_v12 }
 0x19f   : > { %v1520_v13 = vpop.f32.mrf.mxu0 }
 0x1a1   : > { %v858_v18 = vpop.permute.xlu1 %857 }
 0x1a5   : > { %v681_v14 = vld [vmem:[#allocation2] sm:$0xff]  ;;  %v1033_v20 = vpop.permute.xlu1 %1032 }
 0x1a6   : > { %685 = vrot.lane.b32.xlu0 %v681_v14, %s1910_s29  ;;  %1533 = vmatpush3.xpose.msk.msra.mxu1 %vm518_vm2, %v681_v14 }
 0x1a7   : > { %1537 = vmatprep.subr.mxu1 %v1907_v0 }
 0x1a9   : > { %1535 = vmatmul.mubr.msk.f32.vlgmr.msra.gmra.mxu1 %vm518_vm2, %v512_v10 }
 0x1aa   : > { %860 = vrot.lane.b32.xlu0 %v681_v14, %s1911_s7  ;;  %1539 = vmatprep.mubr.msk.f32.mxu1 %vm1908_vm0, %v1907_v0 }
 0x1ae   : > { %1035 = vrot.lane.b32.xlu0 %v681_v14, %s1912_s9 }
 0x218   : > { %v686_v16 = vpop.permute.xlu0 %685 }
 0x219   : > { %1543 = vmatpush3.xpose.msk.msra.mxu0 %vm518_vm2, %v686_v16  ;;  %v1209_v16 = vld [vmem:[#allocation11 + $0x10] sm:$0xff] }
 0x21a   : > { %1552 = vmatprep.subr.mxu0 %v1907_v0 }
 0x21c   : > { %1545 = vmatmul.mubr.msk.f32.vlgmr.msra.gmra.mxu0 %vm518_vm2, %v683_v15  ;;  %v861_v17 = vpop.permute.xlu0 %860  ;;  %v1210_v15 = vld [vmem:[#allocation11 + $0x18] sm:$0xff] }
 0x21d   : > { %1553 = vmatpush3.xpose.msk.msra.mxu0 %vm518_vm2, %v861_v17  ;;  %1554 = vmatprep.mubr.msk.f32.mxu0 %vm1908_vm0, %v1907_v0  ;;  %v1208_v17 = vld [vmem:[#allocation11 + $0x8] sm:$0xff] }
 0x21e   : > { %1562 = vmatprep.subr.mxu0 %v1907_v0 }
 0x220   : > { %1555 = vmatmul.mubr.msk.f32.vlgmr.msra.gmra.mxu0 %vm518_vm2, %v858_v18  ;;  %v1036_v19 = vpop.permute.xlu0 %1035 }
 0x221   : > { %1563 = vmatpush3.xpose.msk.msra.mxu0 %vm518_vm2, %v1036_v19  ;;  %1564 = vmatprep.mubr.msk.f32.mxu0 %vm1908_vm0, %v1907_v0  ;;  %v1207_v19 = vld [vmem:[#allocation11] sm:$0xff] }
 0x222   : > { %1572 = vmatprep.subr.mxu0 %v1907_v0 }
 0x224   : > { %1565 = vmatmul.mubr.msk.f32.vlgmr.msra.gmra.mxu0 %vm518_vm2, %v1033_v20 }
 0x225   : > { %1580 = vmatprep.mubr.msk.f32.mxu0 %vm1908_vm0, %v1907_v0  ;;  %1573 = vmatpush3.msra.mxu0 %v1210_v15 }
 0x226   : > { %1574 = vmatprep.subr.mxu0 %v1907_v0 }
 0x227   : > { %1575 = vmatpush3.msra.mxu0 %v1209_v16 }
 0x228   : > { %1576 = vmatprep.subr.mxu0 %v1907_v0 }
 0x229   : > { %1577 = vmatpush3.msra.mxu0 %v1208_v17 }
 0x22a   : > { %1578 = vmatprep.subr.mxu0 %v1907_v0 }
 0x22b   : > { %1579 = vmatpush3.msra.mxu0 %v1207_v19 }
 0x269   : > { %v591_v22 = vpop.f32.mrf.mxu1 }
 0x26a   : > { %v592_v23 = vadd.f32 %v591_v22, %v516_v21 }
 0x26b   : > { %v1536_v24 = vpop.f32.mrf.mxu1 }
 0x26c   : > { %v595_v25 = vsel %vm518_vm2, %v592_v23, -inf }
 0x26d   : > { %596 = vmax.xlane.f32.xlu0 %v595_v25 }
 0x2dc   : > { %v757_v26 = vpop.f32.mrf.mxu0 }
 0x2dd   : > { %v758_v27 = vadd.f32 %v757_v26, %v516_v21 }
 0x2de   : > { %v1546_v28 = vpop.f32.mrf.mxu0 }
 0x2df   : > { %v761_v29 = vsel %vm518_vm2, %v758_v27, -inf }
 0x2e0   : > { %762 = vmax.xlane.f32.xlu1 %v761_v29  ;;  %v932_v30 = vpop.f32.mrf.mxu0 }
 0x2e1   : > { %v933_v31 = vadd.f32 %v932_v30, %v516_v21 }
 0x2e2   : > { %v1556_v32 = vpop.f32.mrf.mxu0 }
 0x2e3   : > { %v936_v33 = vsel %vm518_vm2, %v933_v31, -inf }
 0x2e4   : > { %937 = vmax.xlane.f32.xlu0 %v936_v33  ;;  %v1107_v34 = vpop.f32.mrf.mxu0 }
 0x2e5   : > { %v1108_v35 = vadd.f32 %v1107_v34, %v516_v21 }
 0x2e6   : > { %v1566_v36 = vpop.f32.mrf.mxu0 }
 0x2e7   : > { %v1111_v37 = vsel %vm518_vm2, %v1108_v35, -inf }
 0x2e8   : > { %1112 = vmax.xlane.f32.xlu0 %v1111_v37 }
 0x2f1   : > { %431 = vrot.lane.b32.xlu1 %v425_v12, %s1909_s1 }
 0x2f6   : > { %v597_v38 = vpop.xlane.xlu0 %596 }
 0x2f7   : > { %v598_v39 = vsub.f32 %v592_v23, %v597_v38 }
 0x2f9   : > { %v599_v40 = vmul.f32 1.442695, %v598_v39 }
 0x2fb   : > { %1687 = vpow2.f32 %v599_v40  ;;  %v1473_v40 = vld [vmem:[%s2242_s4] ss:$0 sm:$0xff] }
 0x308   : > { %v1688_v41 = vpop.eup %1687 }
 0x309   : > { %v601_v42 = vsel %vm518_vm2, %v1688_v41, 0.0 }
 0x30a   : > { %602 = vadd.xlane.f32.xlu0 %v601_v42  ;;  %v1474_v42 = vld [vmem:[%s2243_s5] ss:$0 sm:$0xff] }
 0x369   : > { %v763_v43 = vpop.xlane.xlu1 %762 }
 0x36a   : > { %v764_v44 = vsub.f32 %v758_v27, %v763_v43 }
 0x36c   : > { %v765_v45 = vmul.f32 1.442695, %v764_v44 }
 0x36d   : > { %v432_v46 = vpop.permute.xlu1 %431  ;;  %v938_v47 = vpop.xlane.xlu0 %937 }
 0x36e   : > { %1689 = vpow2.f32 %v765_v45  ;;  %434 = vst.msk [vmem:[#allocation3] sm:$0xff] %vm355_vm1, %v432_v46  ;;  %v939_v48 = vsub.f32 %v933_v31, %v938_v47 }
 0x370   : > { %v940_v49 = vmul.f32 1.442695, %v939_v48 }
 0x371   : > { %v1113_v50 = vpop.xlane.xlu0 %1112 }
 0x372   : > { %1691 = vpow2.f32 %v940_v49  ;;  %v1114_v51 = vsub.f32 %v1108_v35, %v1113_v50 }
 0x374   : > { %v1115_v52 = vmul.f32 1.442695, %v1114_v51 }
 0x375   : > { %v772_v53 = vld [vmem:[#allocation3] sm:$0xff] }
 0x376   : > { %1693 = vpow2.f32 %v1115_v52  ;;  %774 = vrot.lane.b32.xlu1 %v772_v53, %s1910_s29  ;;  %1538 = vmatpush3.msra.mxu1 %v772_v53 }
 0x377   : > { %1547 = vmatprep.subr.mxu1 %v1907_v0 }
 0x37a   : > { %1124 = vrot.lane.b32.xlu1 %v772_v53, %s1912_s9  ;;  %s1317_s9 = scalar_lea.sflag [#allocation7], %s2082_s19 }
 0x37b   : > { %v1690_v54 = vpop.eup %1689 }
 0x37c   : > { %v767_v55 = vsel %vm518_vm2, %v1690_v54, 0.0 }
 0x37d   : > { %768 = vadd.xlane.f32.xlu0 %v767_v55 }
 0x37f   : > { %v1692_v56 = vpop.eup %1691 }
 0x380   : > { %v942_v57 = vsel %vm518_vm2, %v1692_v56, 0.0 }
 0x381   : > { %943 = vadd.xlane.f32.xlu0 %v942_v57 }
 0x383   : > { %v1694_v58 = vpop.eup %1693 }
 0x384   : > { %v1117_v59 = vsel %vm518_vm2, %v1694_v58, 0.0 }
 0x385   : > { %1118 = vadd.xlane.f32.xlu0 %v1117_v59 }
 0x393   : > { %v603_v60 = vpop.xlane.xlu0 %602 }
 0x394   : > { %1695 = vrcp.f32 %v603_v60 }
 0x39b   : > { %949 = vrot.lane.b32.xlu0 %v772_v53, %s1911_s7  ;;  %s1329_s7 = scalar_lea.hbm %s2244_s6, %s1476_s27 }
 0x3a1   : > { %v1696_v61 = vpop.eup %1695 }
 0x3a2   : > { %v605_v62 = vmul.f32 %v1696_v61, %v1688_v41 }
 0x3a4   : > { %1540 = vmatmul.mubr.msk.f32.vlgmr.msra.gmra.mxu1 %vm518_vm2, %v605_v62 }
 0x3a5   : > { %1549 = vmatprep.mubr.msk.f32.mxu1 %vm1908_vm0, %v1907_v0 }
 0x3e8   : > { %v775_v63 = vpop.permute.xlu1 %774 }
 0x3e9   : > { %1548 = vmatpush3.msra.mxu1 %v775_v63 }
 0x3ea   : > { %1557 = vmatprep.subr.mxu1 %v1907_v0 }
 0x3ec   : > { %v1125_v10 = vpop.permute.xlu1 %1124 }
 0x406   : > { %v769_v1 = vpop.xlane.xlu0 %768 }
 0x407   : > { %1697 = vrcp.f32 %v769_v1 }
 0x40a   : > { %v944_v2 = vpop.xlane.xlu0 %943 }
 0x40b   : > { %1699 = vrcp.f32 %v944_v2 }
 0x40e   : > { %v1119_v3 = vpop.xlane.xlu0 %1118 }
 0x40f   : > { %1701 = vrcp.f32 %v1119_v3 }
 0x412   : > { %v950_v7 = vpop.permute.xlu0 %949 }
 0x414   : > { %v1698_v4 = vpop.eup %1697 }
 0x415   : > { %v771_v6 = vmul.f32 %v1698_v4, %v1690_v54 }
 0x417   : > { %1550 = vmatmul.mubr.msk.f32.vlgmr.msra.gmra.mxu1 %vm518_vm2, %v771_v6 }
 0x418   : > { %v1700_v8 = vpop.eup %1699  ;;  %1558 = vmatpush3.msra.mxu1 %v950_v7  ;;  %1559 = vmatprep.mubr.msk.f32.mxu1 %vm1908_vm0, %v1907_v0 }
 0x419   : > { %1567 = vmatprep.subr.mxu1 %v1907_v0  ;;  %v946_v9 = vmul.f32 %v1700_v8, %v1692_v56 }
 0x41b   : > { %1560 = vmatmul.mubr.msk.f32.vlgmr.msra.gmra.mxu1 %vm518_vm2, %v946_v9 }
 0x41c   : > { %v1702_v11 = vpop.eup %1701  ;;  %1568 = vmatpush3.msra.mxu1 %v1125_v10  ;;  %1569 = vmatprep.mubr.msk.f32.mxu1 %vm1908_vm0, %v1907_v0 }
 0x41d   : > { %v1121_v12 = vmul.f32 %v1702_v11, %v1694_v58 }
 0x41f   : > { %1570 = vmatmul.mubr.msk.f32.vlgmr.msra.gmra.mxu1 %vm518_vm2, %v1121_v12 }
 0x464   : > { %v676_v13 = vpop.f32.mrf.mxu1 }
 0x465   : > { %680 = vst.msk [vmem:[#allocation4] sm:$0xff] %vm518_vm2, %v676_v13 }
 0x466   : > { %v1541_v14 = vpop.f32.mrf.mxu1 }
 0x4d7   : > { %v846_v18 = vpop.f32.mrf.mxu1 }
 0x4d8   : > { %851 = vrot.lane.b32.xlu1 %v846_v18, %s1913_s12  ;;  %s1811_s12 = scalar_lea.vmem %s1332_s2, 128 }
 0x4d9   : > { %v1551_v20 = vpop.f32.mrf.mxu1  ;;  %p1812_p1 = scmp.ne.s32.totalorder %s1332_s2, %s1811_s12 }
 0x4db   : > { %v1021_v21 = vpop.f32.mrf.mxu1  ;;  %p1813_p11 = pnand %p1812_p1, %p2052_p13 }
 0x4dc   : > { %1026 = vrot.lane.b32.xlu1 %v1021_v21, %s1914_s30  ;;  %s1916_s30 = smov [#allocation13]  }
 0x4dd   : > { %v1561_v22 = vpop.f32.mrf.mxu1  ;;  %p1814_p6 = pneg %p1813_p11  ;;  %s1815_s24 = sshll.u32 %s1916_s30, 4  ;;  %s1816_s24 = int_to_ptr.vmem [resolvable:$false] %s1815_s24 }
 0x4de   : > { %s1817_s16 = scalar_lea.vmem %s1816_s24, 256  ;;  %p1818_p3 = scmp.lt.s32.totalorder %s1332_s2, %s1816_s24 }
 0x4df   : > { %v1196_v23 = vpop.f32.mrf.mxu1  ;;  %p1819_p5 = scmp.lt.s32.totalorder %s1817_s16, %s1811_s12 }
 0x4e0   : > { %1201 = vrot.lane.b32.xlu1 %v1196_v23, %s1915_s11 }
 0x4e1   : > { %v1571_v24 = vpop.f32.mrf.mxu1  ;;  %p1820_p4 = por %p1819_p5, %p1818_p3 }
 0x4e3   : > { %p1821_p2 = pnand %p1820_p4, %p1814_p6 }
 0x54a   : > { %v852_v25 = vpop.permute.xlu1 %851 }
 0x54b   : > { %855 = vst.msk [vmem:[#allocation4] sm:$0xff] %vm854_vm3, %v852_v25 }
 0x54e   : > { %v1027_v26 = vpop.permute.xlu1 %1026 }
 0x54f   : > { %1030 = vst.msk [vmem:[#allocation4] sm:$0xff] %vm1029_vm4, %v1027_v26 }
 0x552   : > { %v1202_v27 = vpop.permute.xlu1 %1201 }
 0x553   : > { %1205 = vst.msk [vmem:[#allocation4] sm:$0xff] %vm1204_vm5, %v1202_v27 }
 0x55a   : > { %v1206_v28 = vld [vmem:[#allocation4] sm:$0xff] }
 0x55b   : > { %1581 = vmatmul.mubr.msk.f32.vlgmr.msra.gmra.mxu0 %vm355_vm1, %v1206_v28 }
 0x61b   : > { %v1280_v0 = vpop.f32.mrf.mxu0 }
 0x61c   : > { %v1284_v29 = vadd.f32 %v1280_v0, %v2113_v5 }
 0x61d   : > { %v1582_v30 = vpop.f32.mrf.mxu0 }
 0x61e   : > { %v1287_v31 = vsel %vm355_vm1, %v1284_v29, 0.0 }
 0x61f   : > { %1288 = vadd.xlane.f32.xlu1 %v1287_v31 }
 0x6a8   : > { %v1289_v32 = vpop.xlane.xlu1 %1288 }
 0x6a9   : > { %v1291_v33 = vmul.f32 0.03125, %v1289_v32 }
 0x6ab   : > { %v1292_v34 = vsub.f32 %v1284_v29, %v1291_v33 }
 0x6ad   : > { %v1293_v35 = vmul.f32 %v1292_v34, %v1292_v34 }
 0x6af   : > { %v1294_v36 = vsel %vm355_vm1, %v1293_v35, 0.0 }
 0x6b0   : > { %1295 = vadd.xlane.f32.xlu0 %v1294_v36 }
 0x739   : > { %v1296_v37 = vpop.xlane.xlu0 %1295 }
 0x73a   : > { %v1297_v38 = vmul.f32 0.03125, %v1296_v37 }
 0x73c   : > { %v1298_v39 = vadd.f32 1e-06, %v1297_v38 }
 0x73e   : > { %1703 = vrsqrt.f32 %v1298_v39 }
 0x74b   : > { %v1704_v5 = vpop.eup %1703 }
 0x74c   : > { %v1300_v41 = vmul.f32 %v1704_v5, %v1292_v34 }
 0x74e   : > { %v1307_v43 = vmul.f32 %v1473_v40, %v1300_v41 }
 0x750   : > { %v1314_v44 = vadd.f32 %v1474_v42, %v1307_v43 }
 0x752   : > { %1315 = vst.msk [vmem:[%s329_s10] sm:$0xff] %vm355_vm1, %v1314_v44 }
 0x753   : > { %1824 = shalt.err (!%p1821_p2)
}
 0x754   : > { %s1825_s11 = scalar_lea.hbm %s1329_s7, 128  ;;  %s1829_s17 = scalar_lea.hbm %s2244_s6, 256 }
 0x755   : > { %p1826_p8 = scmp.ne.s32.totalorder %s1329_s7, %s1825_s11  ;;  %p1830_p10 = scmp.lt.s32.totalorder %s1329_s7, %s2244_s6 }
 0x756   : > { %p1831_p0 = scmp.lt.s32.totalorder %s1829_s17, %s1825_s11 }
 0x757   : > { %p1827_p12 = pnand %p1826_p8, %p2052_p13 }
 0x758   : > { %p1832_p9 = por %p1831_p0, %p1830_p10 }
 0x759   : > { %p1828_p7 = pneg %p1827_p12 }
 0x75b   : > { %p1833_p1 = pnand %p1832_p9, %p1828_p7 }
 0x75d   : > { %1836 = shalt.err (!%p1833_p1)
}
 0x75e   : > { %1597 = dma.vmem_to_hbm [thread:$0]  (%p2052_p13), %s1332_s2, 128, %s1329_s7, %s1317_s9  }
 0x75f PF: > { %s1343_s27 = sand.u32 1, %s1879_s21   ;;  %p2265_p11 = scmp.ne.s32.totalorder %s2254_s8, 0 }
 0x760   : > { %p2266_p6 = scmp.ge.s32.totalorder %s1899_s26, 2  ;;  %s1344_s10 = scalar_lea.sflag [#allocation7], %s1343_s27 }
 0x762   : > { %p1614_p3 = pnand %p2266_p6, %p2265_p11 }
 0x764   : > { %p1615_p5 = pneg %p1614_p3 }
 0x766   : > { %1874 = dma.done.wait (%p1615_p5), %s1344_s10, 128  }
 0x767   : > { %1876 = vsyncadd (%p1615_p5), %s1344_s10, 4294967168  ;;  %s24_s26 = sadd.s32 1, %s1899_s26   ;;  %s2267_s21 = smov %s1883_s22 }
 0x768   : > { %p21_p4 = scmp.ge.s32.totalorder %s24_s26, 4   ;;  %s2268_s22 = smov %s1887_s23 }
 0x769   : > { %s2269_s23 = smov %s2064_s28  ;;  %s2270_s24 = smov %s1895_s25 }
 0x76a   : > { %s2271_s25 = smov %s2273_s18  ;;  %23 = sbr.rel (!%p21_p4) target bundleno = 11 (0xb), region = 107 }
 0x76f   :  { %1349 = vsyncpa [#allocation6], 1 }
 0x770   :  { %1351 = vsyncpa [#allocation6 + $0x1], 1 }
 0x771   :  { %1352 = vsyncpa [#allocation9], 1 }
 0x772   :  { %1353 = vsyncpa [#allocation12], 1 }
 0x773   :  { %1354 = vsyncpa [#allocation7], 1 }
 0x774   :  { %1356 = vsyncpa [#allocation7 + $0x1], 1 }

</bundles_post_ra>
